<compile_context>
chip_gen: v6e
topology: v6e:2x2x1
jax: 0.10.0
libtpu: 0.0.40
codegen_flags: <defaults>
</compile_context>

<pallas_src>
import jax
import jax.numpy as jnp
from jax.experimental import pallas as pl
from jax.experimental.pallas import tpu as pltpu

LANES = 128  # vreg lane width; fc3 weight is padded to this for the MXU only


# ----------------------------------------------------------------------------
# Kernel
# ----------------------------------------------------------------------------
def mlp_kernel(x_ref, w1_ref, b1_ref, w2_ref, b2_ref, w3_ref, b3_ref, o_ref):
    # fc1 + relu: bf16 MXU operands, f32 accumulation; epilogue stays f32
    # (VPU work in f32 so the same kernel is correct/fast on v5e, no bf16 VPU).
    h1 = jnp.dot(x_ref[...].astype(jnp.bfloat16), w1_ref[...],
                 preferred_element_type=jnp.float32)
    h1 = jnp.maximum(h1 + b1_ref[...], 0.0)
    # fc2 + relu
    h2 = jnp.dot(h1.astype(jnp.bfloat16), w2_ref[...],
                 preferred_element_type=jnp.float32)
    h2 = jnp.maximum(h2 + b2_ref[...], 0.0)
    # fc3: w3/b3 are lane-padded to 128 for the MXU, but only the real D_out
    # columns are stored (out_shape is (B, D_out); masked store is cheap since
    # no slot is near saturation in this kernel).
    out = jnp.dot(h2.astype(jnp.bfloat16), w3_ref[...],
                  preferred_element_type=jnp.float32)
    d_out = o_ref.shape[-1]
    o_ref[...] = (out + b3_ref[...])[:, :d_out].astype(o_ref.dtype)


# ----------------------------------------------------------------------------
# One-time parameter preparation (hoisted out of the per-call path)
# ----------------------------------------------------------------------------
def prepare_params(params):
    """bf16 MXU weights + lane-padded fc3; call once, reuse every forward."""
    w1, b1, w2, b2, w3, b3 = params
    H2, D_out = w3.shape
    w3p = jnp.zeros((H2, LANES), jnp.float32).at[:, :D_out].set(w3)
    b3p = jnp.zeros((1, LANES), jnp.float32).at[:, :D_out].set(b3)
    kparams = (w1.astype(jnp.bfloat16), b1.astype(jnp.float32),
               w2.astype(jnp.bfloat16), b2.astype(jnp.float32),
               w3p.astype(jnp.bfloat16), b3p)
    return kparams, int(D_out)


# ----------------------------------------------------------------------------
# Grid sizing (per-generation)
# ----------------------------------------------------------------------------
def _tensorcores_per_chip():
    try:
        kind = jax.devices()[0].device_kind.lower()
    except Exception:
        return 1
    return 2 if "v7" in kind else 1  # v5e/v6e: 1 TC; v7x: 2 TCs


def _choose_block_batch(B, num_tc, max_block_batch=4096):
    # Single TC (v5e/v6e): the grid is a serial loop, so use ONE step for
    # batches up to a few thousand rows (one big DMA, no per-step overhead).
    # v7x: use an even number of "parallel" steps so both TCs stay busy,
    # without paying more step overhead than necessary.
    n_steps = pl.cdiv(B, max_block_batch)
    if num_tc > 1:
        n_steps = max(n_steps, num_tc)
        n_steps = ((n_steps + num_tc - 1) // num_tc) * num_tc
    if n_steps <= 1:
        return B
    bm = ((pl.cdiv(B, n_steps) + 7) // 8) * 8  # sublane multiple of 8
    return min(bm, B)


# ----------------------------------------------------------------------------
# Pallas forward
# ----------------------------------------------------------------------------
def mlp_forward_pallas(x, kernel_params, d_out, *, block_batch=None):
    w1b, b1, w2b, b2, w3b, b3p = kernel_params
    B, D_in = x.shape
    H1 = w1b.shape[1]   # 64
    H2 = w2b.shape[1]   # 32

    bm = block_batch if block_batch is not None else _choose_block_batch(
        B, _tensorcores_per_chip())
    grid = (pl.cdiv(B, bm),)

    # NOTE: when B is not a multiple of bm the edge block computes on
    # out-of-range rows; Pallas drops the OOB writes and rows are independent,
    # so this is harmless (do not add cross-row reductions to the epilogue).
    return pl.pallas_call(
        mlp_kernel,
        out_shape=jax.ShapeDtypeStruct((B, d_out), jnp.float32),
        grid_spec=pltpu.PrefetchScalarGridSpec(
            num_scalar_prefetch=0,
            grid=grid,
            in_specs=[
                # batch tile of the input
                pl.BlockSpec((bm, D_in), lambda i: (i, 0)),
                # weights / biases resident (constant index_map -> fetched once)
                pl.BlockSpec((D_in, H1), lambda i: (0, 0)),
                pl.BlockSpec((1, H1), lambda i: (0, 0)),
                pl.BlockSpec((H1, H2), lambda i: (0, 0)),
                pl.BlockSpec((1, H2), lambda i: (0, 0)),
                pl.BlockSpec((H2, LANES), lambda i: (0, 0)),
                pl.BlockSpec((1, LANES), lambda i: (0, 0)),
            ],
            out_specs=pl.BlockSpec((bm, d_out), lambda i: (i, 0)),
        ),
        compiler_params=pltpu.CompilerParams(
            # batch rows are independent -> shard grid steps across TCs on v7x
            dimension_semantics=("parallel",),
        ),
    )(x, w1b, b1, w2b, b2, w3b, b3p)


def xla_forward_bf16(x, kernel_params, d_out):
    """Plain fused-XLA path with identical bf16/f32 math (tiny-batch fallback)."""
    w1b, b1, w2b, b2, w3b, b3p = kernel_params
    h1 = jnp.maximum(jnp.dot(x.astype(jnp.bfloat16), w1b,
                             preferred_element_type=jnp.float32) + b1, 0.0)
    h2 = jnp.maximum(jnp.dot(h1.astype(jnp.bfloat16), w2b,
                             preferred_element_type=jnp.float32) + b2, 0.0)
    out = jnp.dot(h2.astype(jnp.bfloat16), w3b,
                  preferred_element_type=jnp.float32) + b3p
    return out[:, :d_out]


def mlp_forward(x, kernel_params, d_out, *, min_pallas_batch=1024):
    """Dispatch: small batches use fused XLA (same math, no launch overhead)."""
    # TODO(synk): re-benchmark the XLA-vs-Pallas crossover on target hardware
    # and adjust min_pallas_batch; 1K rows is an estimate from the roofline.
    if x.shape[0] < min_pallas_batch:
        return xla_forward_bf16(x, kernel_params, d_out)
    return mlp_forward_pallas(x, kernel_params, d_out)


# ----------------------------------------------------------------------------
# Init + references
# ----------------------------------------------------------------------------
def init_params(key, input_size):
    """PyTorch nn.Linear-style init U[-1/sqrt(fan_in), 1/sqrt(fan_in)];
    weights stored as (in, out)."""
    dims = [(input_size, 64), (64, 32), (32, 2)]
    params = []
    for fan_in, fan_out in dims:
        key, kw, kb = jax.random.split(key, 3)
        bound = 1.0 / jnp.sqrt(fan_in)
        w = jax.random.uniform(kw, (fan_in, fan_out), jnp.float32, -bound, bound)
        b = jax.random.uniform(kb, (1, fan_out), jnp.float32, -bound, bound)
        params.extend([w, b])
    return params


def reference_forward(x, params):
    """Pure-f32 reference with the original module semantics."""
    w1, b1, w2, b2, w3, b3 = params
    h1 = jnp.maximum(x @ w1 + b1, 0.0)
    h2 = jnp.maximum(h1 @ w2 + b2, 0.0)
    return h2 @ w3 + b3


def reference_forward_bf16(x, params):
    """Reference matching the kernel's bf16-operand / f32-accumulate math."""
    w1, b1, w2, b2, w3, b3 = params
    h1 = jnp.dot(x.astype(jnp.bfloat16), w1.astype(jnp.bfloat16),
                 preferred_element_type=jnp.float32)
    h1 = jnp.maximum(h1 + b1, 0.0)
    h2 = jnp.dot(h1.astype(jnp.bfloat16), w2.astype(jnp.bfloat16),
                 preferred_element_type=jnp.float32)
    h2 = jnp.maximum(h2 + b2, 0.0)
    out = jnp.dot(h2.astype(jnp.bfloat16), w3.astype(jnp.bfloat16),
                  preferred_element_type=jnp.float32)
    return out + b3


# ----------------------------------------------------------------------------
# Smoke test
# ----------------------------------------------------------------------------
if __name__ == "__main__":
    key = jax.random.PRNGKey(0)
    key, kx = jax.random.split(key)

    batch = 256        # small; stands in for a minibatch of X_train rows
    input_size = 16    # X_train.shape[1] after column deletion
    x = jax.random.normal(kx, (batch, input_size), jnp.float32)

    params = init_params(key, input_size)
    kernel_params, d_out = prepare_params(params)   # one-time cast/pad hoist

    # Exercise the Pallas kernel directly (the dispatcher would route a batch
    # this small to the XLA fallback).
    out = mlp_forward_pallas(x, kernel_params, d_out)
    out = jax.block_until_ready(out)

    assert out.shape == (batch, d_out), out.shape
    # Exact-math comparison (same bf16 operand casts, f32 accumulate).
    ref_bf16 = reference_forward_bf16(x, params)
    assert jnp.allclose(out, ref_bf16, atol=2e-2, rtol=2e-2), "mismatch vs bf16 reference"
    # Loose sanity check against the original pure-f32 module semantics.
    ref_f32 = reference_forward(x, params)
    assert jnp.allclose(out, ref_f32, atol=1e-1, rtol=1e-1), "mismatch vs f32 reference"

    # Dispatcher fallback path uses identical math -> batch-size-independent numerics.
    out_small = jax.block_until_ready(mlp_forward(x[:8], kernel_params, d_out))
    assert jnp.allclose(out_small, ref_bf16[:8], atol=2e-2, rtol=2e-2)

    print("KERNEL_OK")
</pallas_src>

<mosaic_0001>
module attributes {stable_mosaic.version = 11 : i64} {
  func.func @mlp_kernel(%arg0: i32, %arg1: memref<256x16xf32, #tpu.memory_space<vmem>>, %arg2: memref<16x64xbf16, #tpu.memory_space<vmem>>, %arg3: memref<1x64xf32, #tpu.memory_space<vmem>>, %arg4: memref<64x32xbf16, #tpu.memory_space<vmem>>, %arg5: memref<1x32xf32, #tpu.memory_space<vmem>>, %arg6: memref<32x128xbf16, #tpu.memory_space<vmem>>, %arg7: memref<1x128xf32, #tpu.memory_space<vmem>>, %arg8: memref<256x2xf32, #tpu.memory_space<vmem>>) attributes {dimension_semantics = [#tpu.dimension_semantics<parallel>], iteration_bounds = array<i64: 1>, scalar_prefetch = 0 : i64, scratch_operands = 0 : i64, tpu.core_type = #tpu.core_type<tc>, window_params = [{transform_indices = @transform_0, window_bounds = array<i64: 256, 16>}, {pipeline_mode = #tpu.pipeline_mode<synchronous>, transform_indices = @transform_1, window_bounds = array<i64: 16, 64>}, {pipeline_mode = #tpu.pipeline_mode<synchronous>, transform_indices = @transform_2, window_bounds = array<i64: 1, 64>}, {pipeline_mode = #tpu.pipeline_mode<synchronous>, transform_indices = @transform_3, window_bounds = array<i64: 64, 32>}, {pipeline_mode = #tpu.pipeline_mode<synchronous>, transform_indices = @transform_4, window_bounds = array<i64: 1, 32>}, {pipeline_mode = #tpu.pipeline_mode<synchronous>, transform_indices = @transform_5, window_bounds = array<i64: 32, 128>}, {pipeline_mode = #tpu.pipeline_mode<synchronous>, transform_indices = @transform_6, window_bounds = array<i64: 1, 128>}, {transform_indices = @transform_7, window_bounds = array<i64: 256, 2>}]} {
    %c0 = arith.constant 0 : index
    %c0_0 = arith.constant 0 : index
    %0 = vector.load %arg1[%c0, %c0_0] : memref<256x16xf32, #tpu.memory_space<vmem>>, vector<256x16xf32>
    %1 = arith.truncf %0 : vector<256x16xf32> to vector<256x16xbf16>
    %c0_1 = arith.constant 0 : index
    %c0_2 = arith.constant 0 : index
    %2 = vector.load %arg2[%c0_1, %c0_2] : memref<16x64xbf16, #tpu.memory_space<vmem>>, vector<16x64xbf16>
    %cst = arith.constant dense<0.000000e+00> : vector<256x64xf32>
    %3 = tpu.matmul %1, %2, %cst {dimension_numbers = #tpu.dot_dimension_numbers<[1], [0], [0], [1], [0, 0, 1, 1], [], []>} : vector<256x16xbf16>, vector<16x64xbf16>, vector<256x64xf32> -> vector<256x64xf32>
    %c0_3 = arith.constant 0 : index
    %c0_4 = arith.constant 0 : index
    %4 = vector.load %arg3[%c0_3, %c0_4] : memref<1x64xf32, #tpu.memory_space<vmem>>, vector<1x64xf32>
    %5 = vector.broadcast %4 : vector<1x64xf32> to vector<256x64xf32>
    %6 = arith.addf %3, %5 : vector<256x64xf32>
    %cst_5 = arith.constant 0.000000e+00 : f32
    %7 = vector.broadcast %cst_5 : f32 to vector<256x64xf32>
    %8 = arith.maximumf %6, %7 : vector<256x64xf32>
    %9 = arith.truncf %8 : vector<256x64xf32> to vector<256x64xbf16>
    %c0_6 = arith.constant 0 : index
    %c0_7 = arith.constant 0 : index
    %10 = vector.load %arg4[%c0_6, %c0_7] : memref<64x32xbf16, #tpu.memory_space<vmem>>, vector<64x32xbf16>
    %cst_8 = arith.constant dense<0.000000e+00> : vector<256x32xf32>
    %11 = tpu.matmul %9, %10, %cst_8 {dimension_numbers = #tpu.dot_dimension_numbers<[1], [0], [0], [1], [0, 0, 1, 1], [], []>} : vector<256x64xbf16>, vector<64x32xbf16>, vector<256x32xf32> -> vector<256x32xf32>
    %c0_9 = arith.constant 0 : index
    %c0_10 = arith.constant 0 : index
    %12 = vector.load %arg5[%c0_9, %c0_10] : memref<1x32xf32, #tpu.memory_space<vmem>>, vector<1x32xf32>
    %13 = vector.broadcast %12 : vector<1x32xf32> to vector<256x32xf32>
    %14 = arith.addf %11, %13 : vector<256x32xf32>
    %cst_11 = arith.constant 0.000000e+00 : f32
    %15 = vector.broadcast %cst_11 : f32 to vector<256x32xf32>
    %16 = arith.maximumf %14, %15 : vector<256x32xf32>
    %17 = arith.truncf %16 : vector<256x32xf32> to vector<256x32xbf16>
    %c0_12 = arith.constant 0 : index
    %c0_13 = arith.constant 0 : index
    %18 = vector.load %arg6[%c0_12, %c0_13] : memref<32x128xbf16, #tpu.memory_space<vmem>>, vector<32x128xbf16>
    %cst_14 = arith.constant dense<0.000000e+00> : vector<256x128xf32>
    %19 = tpu.matmul %17, %18, %cst_14 {dimension_numbers = #tpu.dot_dimension_numbers<[1], [0], [0], [1], [0, 0, 1, 1], [], []>} : vector<256x32xbf16>, vector<32x128xbf16>, vector<256x128xf32> -> vector<256x128xf32>
    %c0_15 = arith.constant 0 : index
    %c0_16 = arith.constant 0 : index
    %20 = vector.load %arg7[%c0_15, %c0_16] : memref<1x128xf32, #tpu.memory_space<vmem>>, vector<1x128xf32>
    %21 = vector.broadcast %20 : vector<1x128xf32> to vector<256x128xf32>
    %22 = arith.addf %19, %21 : vector<256x128xf32>
    %23 = vector.extract_strided_slice %22 {offsets = [0, 0], sizes = [256, 2], strides = [1, 1]} : vector<256x128xf32> to vector<256x2xf32>
    %c0_17 = arith.constant 0 : index
    %c0_18 = arith.constant 0 : index
    %24 = vector.load %arg8[%c0_17, %c0_18] : memref<256x2xf32, #tpu.memory_space<vmem>>, vector<256x2xf32>
    tpu.vector_store %arg8[%c0_17, %c0_18], %23 {strides = array<i32>} : memref<256x2xf32, #tpu.memory_space<vmem>>, vector<256x2xf32>,
    return
  }
  func.func @transform_0(%arg0: i32) -> (i32, i32) {
    %c0_i32 = arith.constant 0 : i32
    %c0_i32_0 = arith.constant 0 : i32
    return %arg0, %c0_i32 : i32, i32
  }
  func.func @transform_1(%arg0: i32) -> (i32, i32) {
    %c0_i32 = arith.constant 0 : i32
    %c0_i32_0 = arith.constant 0 : i32
    %c0_i32_1 = arith.constant 0 : i32
    return %c0_i32, %c0_i32_0 : i32, i32
  }
  func.func @transform_2(%arg0: i32) -> (i32, i32) {
    %c0_i32 = arith.constant 0 : i32
    %c0_i32_0 = arith.constant 0 : i32
    %c0_i32_1 = arith.constant 0 : i32
    return %c0_i32, %c0_i32_0 : i32, i32
  }
  func.func @transform_3(%arg0: i32) -> (i32, i32) {
    %c0_i32 = arith.constant 0 : i32
    %c0_i32_0 = arith.constant 0 : i32
    %c0_i32_1 = arith.constant 0 : i32
    return %c0_i32, %c0_i32_0 : i32, i32
  }
  func.func @transform_4(%arg0: i32) -> (i32, i32) {
    %c0_i32 = arith.constant 0 : i32
    %c0_i32_0 = arith.constant 0 : i32
    %c0_i32_1 = arith.constant 0 : i32
    return %c0_i32, %c0_i32_0 : i32, i32
  }
  func.func @transform_5(%arg0: i32) -> (i32, i32) {
    %c0_i32 = arith.constant 0 : i32
    %c0_i32_0 = arith.constant 0 : i32
    %c0_i32_1 = arith.constant 0 : i32
    return %c0_i32, %c0_i32_0 : i32, i32
  }
  func.func @transform_6(%arg0: i32) -> (i32, i32) {
    %c0_i32 = arith.constant 0 : i32
    %c0_i32_0 = arith.constant 0 : i32
    %c0_i32_1 = arith.constant 0 : i32
    return %c0_i32, %c0_i32_0 : i32, i32
  }
  func.func @transform_7(%arg0: i32) -> (i32, i32) {
    %c0_i32 = arith.constant 0 : i32
    %c0_i32_0 = arith.constant 0 : i32
    return %arg0, %c0_i32 : i32, i32
  }
}

</mosaic_0001>

<bundles_post_ra>
// kernel: tpu_custom_call.1
= control target key start
LH: loop header
LB: loop body
LE: loop exit
PB: predicated region body
PF: predicated region fallthrough
CT: control target
= control target key end

     0   :  { %vm90_vm0 = vcmask 130048   ;;  %vm387_vm1 = vcmask 523264   ;;  %vm668_vm2 = vcmask 261120   ;;  %vm878_vm3 = vcmask 15360   ;;  %s1606_s1 = inlined_call_operand.vmem [shape: bf16[16,64], index: 1, kind: input, shape index: {}]   ;;  %s1607_s0 = inlined_call_operand.vmem [shape: f32[256,16], index: 0, kind: input, shape index: {}]   ;;  %s1608_s3 = inlined_call_operand.vmem [shape: bf16[64,32], index: 3, kind: input, shape index: {}]   ;;  %s1609_s5 = inlined_call_operand.vmem [shape: bf16[32,128], index: 5, kind: input, shape index: {}]   ;;  %s1610_s2 = inlined_call_operand.vmem [shape: f32[1,64], index: 2, kind: input, shape index: {}]   ;;  %s1611_s4 = inlined_call_operand.vmem [shape: f32[1,32], index: 4, kind: input, shape index: {}]   ;;  %s1612_s6 = inlined_call_operand.vmem [shape: f32[1,128], index: 6, kind: input, shape index: {}]   ;;  %s1613_s7 = inlined_call_operand.vmem [shape: f32[256,2], index: 7, kind: output, shape index: {}]  }
   0x1   :  { %v1140_v0 = vld [vmem:[%s1606_s1] sm:$0xff]   ;;  %v28_v2 = vld [vmem:[%s1607_s0 + $0x8] sm:$0xff]  ;;  %v29_v3 = vld [vmem:[%s1607_s0 + $0x10] sm:$0xff] }
   0x2   :  { %v27_v1 = vld [vmem:[%s1607_s0] sm:$0xff]  ;;  %1028 = vmatprep.subr.bf16.mxu0 %v1140_v0  ;;  %v30_v5 = vld [vmem:[%s1607_s0 + $0x18] sm:$0xff]  ;;  %v32_v7 = vld [vmem:[%s1607_s0 + $0x28] sm:$0xff]  ;;  %1138 = vmatprep.subr.bf16.mxu1 %v1140_v0 }
   0x3   :  { %v59_v4 = vpack.c.bf16 %v28_v2, %v27_v1  ;;  %v31_v6 = vld [vmem:[%s1607_s0 + $0x20] sm:$0xff]  ;;  %1029 = vmatpush3.bf16.msra.mxu0 %v1140_v0  ;;  %v60_v8 = vpack.c.bf16 %v30_v5, %v29_v3  ;;  %1139 = vmatpush3.bf16.msra.mxu1 %v1140_v0  ;;  %v33_v10 = vld [vmem:[%s1607_s0 + $0x30] sm:$0xff]  ;;  %v34_v11 = vld [vmem:[%s1607_s0 + $0x38] sm:$0xff] }
   0x4   :  { %v61_v9 = vpack.c.bf16 %v32_v7, %v31_v6  ;;  %v43_v12 = vld [vmem:[%s1607_s0 + $0x80] sm:$0xff]  ;;  %v44_v13 = vld [vmem:[%s1607_s0 + $0x88] sm:$0xff]  ;;  %v45_v15 = vld [vmem:[%s1607_s0 + $0x90] sm:$0xff]  ;;  %v62_v23 = vpack.c.bf16 %v34_v11, %v33_v10 }
   0x5   :  { %1030 = vmatprep.mubr.msk.bf16.mxu0 %vm90_vm0, %v59_v4  ;;  %v67_v14 = vpack.c.bf16 %v44_v13, %v43_v12  ;;  %v46_v16 = vld [vmem:[%s1607_s0 + $0x98] sm:$0xff]  ;;  %v47_v17 = vld [vmem:[%s1607_s0 + $0xa0] sm:$0xff]  ;;  %v36_v19 = vld [vmem:[%s1607_s0 + $0x48] sm:$0xff] }
   0x6   :  { %1031 = vmatmul.mubr.msk.bf16.vlgmr.msra.gmra.mxu0 %vm90_vm0, %v60_v8  ;;  %v35_v18 = vld [vmem:[%s1607_s0 + $0x40] sm:$0xff]  ;;  %v68_v20 = vpack.c.bf16 %v46_v16, %v45_v15  ;;  %v48_v21 = vld [vmem:[%s1607_s0 + $0xa8] sm:$0xff]  ;;  %v49_v24 = vld [vmem:[%s1607_s0 + $0xb0] sm:$0xff] }
   0x7   :  { %1034 = vmatprep.mubr.msk.bf16.mxu0 %vm90_vm0, %v61_v9  ;;  %1046 = vmatprep.mubr.msk.bf16.mxu1 %vm90_vm0, %v67_v14  ;;  %v69_v22 = vpack.c.bf16 %v48_v21, %v47_v17  ;;  %v50_v25 = vld [vmem:[%s1607_s0 + $0xb8] sm:$0xff]  ;;  %v63_v26 = vpack.c.bf16 %v36_v19, %v35_v18  ;;  %v51_v27 = vld [vmem:[%s1607_s0 + $0xc0] sm:$0xff]  ;;  %v52_v28 = vld [vmem:[%s1607_s0 + $0xc8] sm:$0xff] }
   0x8   :  { %1047 = vmatmul.mubr.msk.bf16.vlgmr.msra.gmra.mxu1 %vm90_vm0, %v68_v20  ;;  %v1141_v29 = vld [vmem:[%s1608_s3 + $0x18] sm:$0xff]   ;;  %v1142_v30 = vld [vmem:[%s1608_s3 + $0x10] sm:$0xff]   ;;  %v70_v31 = vpack.c.bf16 %v50_v25, %v49_v24  ;;  %v71_v34 = vpack.c.bf16 %v52_v28, %v51_v27  ;;  %v39_v35 = vld [vmem:[%s1607_s0 + $0x60] sm:$0xff] }
   0x9   :  { %1050 = vmatprep.mubr.msk.bf16.mxu1 %vm90_vm0, %v69_v22  ;;  %1062 = vmatprep.subr.bf16.mxu1 %v1141_v29  ;;  %v37_v32 = vld [vmem:[%s1607_s0 + $0x50] sm:$0xff]  ;;  %v38_v33 = vld [vmem:[%s1607_s0 + $0x58] sm:$0xff]  ;;  %v40_v36 = vld [vmem:[%s1607_s0 + $0x68] sm:$0xff] }
   0xa   :  { %1063 = vmatpush3.bf16.msra.mxu1 %v1141_v29  ;;  %v1143_v37 = vld [vmem:[%s1608_s3 + $0x8] sm:$0xff]   ;;  %v64_v38 = vpack.c.bf16 %v38_v33, %v37_v32  ;;  %v65_v39 = vpack.c.bf16 %v40_v36, %v39_v35  ;;  %v53_v40 = vld [vmem:[%s1607_s0 + $0xd0] sm:$0xff]  ;;  %v54_v41 = vld [vmem:[%s1607_s0 + $0xd8] sm:$0xff] }
   0xb   :  { %1064 = vmatprep.subr.bf16.mxu1 %v1142_v30  ;;  %v55_v42 = vld [vmem:[%s1607_s0 + $0xe0] sm:$0xff]  ;;  %v56_v43 = vld [vmem:[%s1607_s0 + $0xe8] sm:$0xff]  ;;  %v72_v44 = vpack.c.bf16 %v54_v41, %v53_v40  ;;  %v41_v45 = vld [vmem:[%s1607_s0 + $0x70] sm:$0xff] }
   0xc   :  { %v42_v46 = vld [vmem:[%s1607_s0 + $0x78] sm:$0xff]  ;;  %v73_v47 = vpack.c.bf16 %v56_v43, %v55_v42  ;;  %v57_v49 = vld [vmem:[%s1607_s0 + $0xf0] sm:$0xff]  ;;  %v1144_v52 = vld [vmem:[%s1608_s3] sm:$0xff]  }
   0xd   :  { %v66_v48 = vpack.c.bf16 %v42_v46, %v41_v45  ;;  %v58_v50 = vld [vmem:[%s1607_s0 + $0xf8] sm:$0xff]  ;;  %v1145_v53 = vld [vmem:[%s1609_s5 + $0x8] sm:$0xff]   ;;  %v1146_v54 = vld [vmem:[%s1609_s5] sm:$0xff]  }
   0xe   :  { %1035 = vmatmul.mubr.msk.bf16.gmra.mxu0 %vm90_vm0, %v62_v23  ;;  %1065 = vmatpush3.bf16.msra.mxu1 %v1142_v30  ;;  %v74_v51 = vpack.c.bf16 %v58_v50, %v57_v49  ;;  %v1323_v57 = vld [vmem:[%s1610_s2] ss:$0 sm:$0xff] }
   0xf   :  { %1038 = vmatprep.mubr.msk.bf16.mxu0 %vm90_vm0, %v63_v26  ;;  %1066 = vmatprep.subr.bf16.mxu1 %v1143_v37 }
  0x10   :  { %1051 = vmatmul.mubr.msk.bf16.gmra.mxu1 %vm90_vm0, %v70_v31  ;;  %1102 = vmatprep.subr.bf16.mxu0 %v1145_v53 }
  0x11   :  { %1054 = vmatprep.mubr.msk.bf16.mxu1 %vm90_vm0, %v71_v34  ;;  %1103 = vmatpush3.bf16.msra.mxu0 %v1145_v53 }
  0x12   :  { %1067 = vmatpush3.bf16.msra.mxu1 %v1143_v37  ;;  %1104 = vmatprep.subr.bf16.mxu0 %v1146_v54 }
  0x13   :  { %1068 = vmatprep.subr.bf16.mxu1 %v1144_v52 }
  0x15   :  { %1105 = vmatpush3.bf16.msra.mxu0 %v1146_v54 }
  0x16   :  { %1039 = vmatmul.mubr.msk.bf16.gmra.mxu0 %vm90_vm0, %v64_v38  ;;  %1069 = vmatpush3.bf16.msra.mxu1 %v1144_v52 }
  0x17   :  { %1042 = vmatprep.mubr.msk.bf16.mxu0 %vm90_vm0, %v65_v39 }
  0x18   :  { %1055 = vmatmul.mubr.msk.bf16.gmra.mxu1 %vm90_vm0, %v72_v44 }
  0x19   :  { %1058 = vmatprep.mubr.msk.bf16.mxu1 %vm90_vm0, %v73_v47 }
  0x1e   :  { %1043 = vmatmul.mubr.msk.bf16.gmra.mxu0 %vm90_vm0, %v66_v48 }
  0x20   :  { %1059 = vmatmul.mubr.msk.bf16.gmra.mxu1 %vm90_vm0, %v74_v51 }
  0xc6   :  { %v1032_v55 = vpop.f32.mrf.mxu0 }
  0xc7   :  { %v182_v62 = vadd.f32 %v1032_v55, %v1323_v57 }
  0xc8   :  { %v173_v56 = vpop.f32.mrf.mxu0  ;;  %v1325_v59 = vpop.f32.mrf.mxu1 }
  0xc9   :  { %v174_v60 = vadd.f32 %v1323_v57, %v173_v56  ;;  %v302_v7 = vmax.f32 %v182_v62, 0.0 }
  0xca   :  { %v1033_v58 = vpop.f32.mrf.mxu0  ;;  %v237_v0 = vpop.f32.mrf.mxu1 }
  0xcb   :  { %v185_v61 = vadd.f32 %v1033_v58, %v1323_v57  ;;  %v300_v5 = vmax.f32 %v174_v60, 0.0  ;;  %v238_v45 = vadd.f32 %v1323_v57, %v237_v0 }
  0xcc   :  { %v176_v63 = vpop.f32.mrf.mxu0  ;;  %v1331_v4 = vpop.f32.mrf.mxu1 }
  0xcd   :  { %v177_v1 = vadd.f32 %v1323_v57, %v176_v63  ;;  %v303_v2 = vmax.f32 %v185_v61, 0.0  ;;  %v316_v54 = vmax.f32 %v238_v45, 0.0 }
  0xce   :  { %v1036_v3 = vpop.f32.mrf.mxu0  ;;  %v240_v9 = vpop.f32.mrf.mxu1 }
  0xcf   :  { %v301_v6 = vmax.f32 %v177_v1, 0.0  ;;  %v333_v11 = vpack.c.bf16 %v303_v2, %v302_v7  ;;  %v198_v16 = vadd.f32 %v1036_v3, %v1323_v57  ;;  %v241_v46 = vadd.f32 %v1323_v57, %v240_v9 }
  0xd0   :  { %v189_v8 = vpop.f32.mrf.mxu0  ;;  %v1333_v13 = vpop.f32.mrf.mxu1  ;;  %v249_v7 = vadd.f32 %v1331_v4, %v1323_v57 }
  0xd1   :  { %v332_v10 = vpack.c.bf16 %v301_v6, %v300_v5  ;;  %v190_v14 = vadd.f32 %v1323_v57, %v189_v8  ;;  %v306_v25 = vmax.f32 %v198_v16, 0.0  ;;  %v317_v56 = vmax.f32 %v241_v46, 0.0 }
  0xd2   :  { %v1037_v12 = vpop.f32.mrf.mxu0  ;;  %v253_v18 = vpop.f32.mrf.mxu1  ;;  %v246_v5 = vadd.f32 %v1325_v59, %v1323_v57  ;;  %v262_v4 = vadd.f32 %v1333_v13, %v1323_v57 }
  0xd3   :  { %v201_v15 = vadd.f32 %v1037_v12, %v1323_v57  ;;  %1070 = vmatprep.mubr.msk.bf16.mxu1 %vm387_vm1, %v332_v10  ;;  %v304_v23 = vmax.f32 %v190_v14, 0.0  ;;  %v340_v1 = vpack.c.bf16 %v317_v56, %v316_v54  ;;  %v254_v2 = vadd.f32 %v1323_v57, %v253_v18 }
  0xd4   :  { %v192_v17 = vpop.f32.mrf.mxu0  ;;  %1071 = vmatmul.mubr.msk.bf16.vlgmr.msra.gmra.mxu1 %vm387_vm1, %v333_v11  ;;  %v1341_v22 = vpop.f32.mrf.mxu1  ;;  %v318_v11 = vmax.f32 %v246_v5, 0.0  ;;  %v319_v12 = vmax.f32 %v249_v7, 0.0 }
  0xd5   :  { %v193_v19 = vadd.f32 %v1323_v57, %v192_v17  ;;  %v307_v20 = vmax.f32 %v201_v15, 0.0  ;;  %v320_v9 = vmax.f32 %v254_v2, 0.0  ;;  %v265_v18 = vadd.f32 %v1341_v22, %v1323_v57 }
  0xd6   :  { %v1040_v21 = vpop.f32.mrf.mxu0  ;;  %v256_v27 = vpop.f32.mrf.mxu1  ;;  %v341_v17 = vpack.c.bf16 %v319_v12, %v318_v11 }
  0xd7   :  { %v305_v24 = vmax.f32 %v193_v19, 0.0  ;;  %v335_v29 = vpack.c.bf16 %v307_v20, %v306_v25  ;;  %v214_v34 = vadd.f32 %v1040_v21, %v1323_v57  ;;  %v257_v3 = vadd.f32 %v1323_v57, %v256_v27 }
  0xd8   :  { %v205_v26 = vpop.f32.mrf.mxu0  ;;  %v1343_v31 = vpop.f32.mrf.mxu1 }
  0xd9   :  { %v334_v28 = vpack.c.bf16 %v305_v24, %v304_v23  ;;  %v206_v32 = vadd.f32 %v1323_v57, %v205_v26  ;;  %v310_v42 = vmax.f32 %v214_v34, 0.0  ;;  %v321_v10 = vmax.f32 %v257_v3, 0.0 }
  0xda   :  { %v1041_v30 = vpop.f32.mrf.mxu0  ;;  %v269_v39 = vpop.f32.mrf.mxu1  ;;  %v322_v23 = vmax.f32 %v262_v4, 0.0  ;;  %v323_v24 = vmax.f32 %v265_v18, 0.0  ;;  %v278_v13 = vadd.f32 %v1343_v31, %v1323_v57 }
  0xdb   :  { %v217_v33 = vadd.f32 %v1041_v30, %v1323_v57  ;;  %1074 = vmatprep.mubr.msk.bf16.mxu1 %vm387_vm1, %v334_v28  ;;  %v308_v40 = vmax.f32 %v206_v32, 0.0  ;;  %v342_v15 = vpack.c.bf16 %v321_v10, %v320_v9  ;;  %v270_v16 = vadd.f32 %v1323_v57, %v269_v39 }
  0xdc   :  { %v208_v35 = vpop.f32.mrf.mxu0  ;;  %1075 = vmatmul.mubr.msk.bf16.gmra.mxu1 %vm387_vm1, %v335_v29  ;;  %v1057_v49 = vpop.f32.mrf.mxu1  ;;  %v343_v29 = vpack.c.bf16 %v323_v24, %v322_v23 }
  0xdd   :  { %v209_v36 = vadd.f32 %v1323_v57, %v208_v35  ;;  %v311_v37 = vmax.f32 %v217_v33, 0.0  ;;  %v324_v20 = vmax.f32 %v270_v16, 0.0  ;;  %v281_v22 = vadd.f32 %v1057_v49, %v1323_v57 }
  0xde   :  { %v1044_v38 = vpop.f32.mrf.mxu0  ;;  %v272_v60 = vpop.f32.mrf.mxu1  ;;  %v326_v33 = vmax.f32 %v278_v13, 0.0 }
  0xdf   :  { %v309_v41 = vmax.f32 %v209_v36, 0.0  ;;  %v337_v47 = vpack.c.bf16 %v311_v37, %v310_v42  ;;  %v230_v52 = vadd.f32 %v1044_v38, %v1323_v57  ;;  %v273_v59 = vadd.f32 %v1323_v57, %v272_v60 }
  0xe0   :  { %v221_v43 = vpop.f32.mrf.mxu0  ;;  %v1060_v8 = vpop.f32.mrf.mxu1  ;;  %v327_v34 = vmax.f32 %v281_v22, 0.0 }
  0xe1   :  { %v336_v44 = vpack.c.bf16 %v309_v41, %v308_v40  ;;  %v222_v50 = vadd.f32 %v1323_v57, %v221_v43  ;;  %v314_v63 = vmax.f32 %v230_v52, 0.0  ;;  %v325_v21 = vmax.f32 %v273_v59, 0.0  ;;  %v1391_v43 = vld [vmem:[%s1611_s4] ss:$0 sm:$0xff] }
  0xe2   :  { %v1045_v48 = vpop.f32.mrf.mxu0  ;;  %v285_v14 = vpop.f32.mrf.mxu1  ;;  %v345_v36 = vpack.c.bf16 %v327_v34, %v326_v33  ;;  %v294_v37 = vadd.f32 %v1060_v8, %v1323_v57 }
  0xe3   :  { %v233_v51 = vadd.f32 %v1045_v48, %v1323_v57  ;;  %1078 = vmatprep.mubr.msk.bf16.mxu1 %vm387_vm1, %v336_v44  ;;  %v312_v61 = vmax.f32 %v222_v50, 0.0  ;;  %v344_v26 = vpack.c.bf16 %v325_v21, %v324_v20  ;;  %v286_v27 = vadd.f32 %v1323_v57, %v285_v14 }
  0xe4   :  { %v224_v53 = vpop.f32.mrf.mxu0  ;;  %1079 = vmatmul.mubr.msk.bf16.gmra.mxu1 %vm387_vm1, %v337_v47  ;;  %v1061_v19 = vpop.f32.mrf.mxu1  ;;  %v330_v31 = vmax.f32 %v294_v37, 0.0 }
  0xe5   :  { %v225_v55 = vadd.f32 %v1323_v57, %v224_v53  ;;  %v315_v58 = vmax.f32 %v233_v51, 0.0  ;;  %v328_v30 = vmax.f32 %v286_v27, 0.0  ;;  %v297_v38 = vadd.f32 %v1061_v19, %v1323_v57 }
  0xe6   :  { %v288_v25 = vpop.f32.mrf.mxu1 }
  0xe7   :  { %v313_v62 = vmax.f32 %v225_v55, 0.0  ;;  %v339_v6 = vpack.c.bf16 %v315_v58, %v314_v63  ;;  %v289_v28 = vadd.f32 %v1323_v57, %v288_v25  ;;  %v331_v39 = vmax.f32 %v297_v38, 0.0 }
  0xe9   :  { %v338_v0 = vpack.c.bf16 %v313_v62, %v312_v61  ;;  %v329_v32 = vmax.f32 %v289_v28, 0.0  ;;  %v347_v40 = vpack.c.bf16 %v331_v39, %v330_v31 }
  0xeb   :  { %1082 = vmatprep.mubr.msk.bf16.mxu1 %vm387_vm1, %v338_v0  ;;  %v346_v35 = vpack.c.bf16 %v329_v32, %v328_v30 }
  0xec   :  { %1083 = vmatmul.mubr.msk.bf16.gmra.mxu1 %vm387_vm1, %v339_v6 }
  0xed   :  { %1086 = vmatprep.mubr.msk.bf16.mxu1 %vm387_vm1, %v340_v1 }
  0xf4   :  { %1087 = vmatmul.mubr.msk.bf16.gmra.mxu1 %vm387_vm1, %v341_v17 }
  0xf5   :  { %1090 = vmatprep.mubr.msk.bf16.mxu1 %vm387_vm1, %v342_v15 }
  0xfc   :  { %1091 = vmatmul.mubr.msk.bf16.gmra.mxu1 %vm387_vm1, %v343_v29 }
  0xfd   :  { %1094 = vmatprep.mubr.msk.bf16.mxu1 %vm387_vm1, %v344_v26 }
 0x104   :  { %1095 = vmatmul.mubr.msk.bf16.gmra.mxu1 %vm387_vm1, %v345_v36 }
 0x105   :  { %1098 = vmatprep.mubr.msk.bf16.mxu1 %vm387_vm1, %v346_v35 }
 0x10c   :  { %1099 = vmatmul.mubr.msk.bf16.gmra.mxu1 %vm387_vm1, %v347_v40 }
 0x194   :  { %v1072_v41 = vpop.f32.mrf.mxu1 }
 0x195   :  { %v479_v46 = vadd.f32 %v1072_v41, %v1391_v43 }
 0x196   :  { %v470_v42 = vpop.f32.mrf.mxu1 }
 0x197   :  { %v471_v45 = vadd.f32 %v1391_v43, %v470_v42  ;;  %v599_v53 = vmax.f32 %v479_v46, 0.0 }
 0x198   :  { %v1073_v44 = vpop.f32.mrf.mxu1 }
 0x199   :  { %v482_v57 = vadd.f32 %v1073_v44, %v1391_v43  ;;  %v597_v51 = vmax.f32 %v471_v45, 0.0 }
 0x19a   :  { %v473_v47 = vpop.f32.mrf.mxu1 }
 0x19b   :  { %v474_v48 = vadd.f32 %v1391_v43, %v473_v47  ;;  %v600_v49 = vmax.f32 %v482_v57, 0.0 }
 0x19c   :  { %v1076_v50 = vpop.f32.mrf.mxu1 }
 0x19d   :  { %v598_v52 = vmax.f32 %v474_v48, 0.0  ;;  %v630_v56 = vpack.c.bf16 %v600_v49, %v599_v53  ;;  %v495_v62 = vadd.f32 %v1076_v50, %v1391_v43 }
 0x19e   :  { %v486_v54 = vpop.f32.mrf.mxu1 }
 0x19f   :  { %v629_v55 = vpack.c.bf16 %v598_v52, %v597_v51  ;;  %v487_v60 = vadd.f32 %v1391_v43, %v486_v54  ;;  %v603_v6 = vmax.f32 %v495_v62, 0.0 }
 0x1a0   :  { %v1077_v58 = vpop.f32.mrf.mxu1 }
 0x1a1   :  { %v498_v61 = vadd.f32 %v1077_v58, %v1391_v43  ;;  %1106 = vmatprep.mubr.msk.bf16.mxu0 %vm668_vm2, %v629_v55  ;;  %v601_v3 = vmax.f32 %v487_v60, 0.0 }
 0x1a2   :  { %v489_v63 = vpop.f32.mrf.mxu1  ;;  %1107 = vmatmul.mubr.msk.bf16.vlgmr.msra.gmra.mxu0 %vm668_vm2, %v630_v56 }
 0x1a3   :  { %v490_v0 = vadd.f32 %v1391_v43, %v489_v63  ;;  %v604_v1 = vmax.f32 %v498_v61, 0.0 }
 0x1a4   :  { %v1080_v2 = vpop.f32.mrf.mxu1 }
 0x1a5   :  { %v602_v5 = vmax.f32 %v490_v0, 0.0  ;;  %v632_v9 = vpack.c.bf16 %v604_v1, %v603_v6  ;;  %v511_v14 = vadd.f32 %v1080_v2, %v1391_v43 }
 0x1a6   :  { %v502_v7 = vpop.f32.mrf.mxu1 }
 0x1a7   :  { %v631_v8 = vpack.c.bf16 %v602_v5, %v601_v3  ;;  %v503_v11 = vadd.f32 %v1391_v43, %v502_v7  ;;  %v607_v19 = vmax.f32 %v511_v14, 0.0 }
 0x1a8   :  { %v1081_v10 = vpop.f32.mrf.mxu1 }
 0x1a9   :  { %v514_v12 = vadd.f32 %v1081_v10, %v1391_v43  ;;  %1110 = vmatprep.mubr.msk.bf16.mxu0 %vm668_vm2, %v631_v8  ;;  %v605_v4 = vmax.f32 %v503_v11, 0.0 }
 0x1aa   :  { %v505_v15 = vpop.f32.mrf.mxu1  ;;  %1111 = vmatmul.mubr.msk.bf16.gmra.mxu0 %vm668_vm2, %v632_v9 }
 0x1ab   :  { %v506_v16 = vadd.f32 %v1391_v43, %v505_v15  ;;  %v608_v59 = vmax.f32 %v514_v12, 0.0 }
 0x1ac   :  { %v1084_v17 = vpop.f32.mrf.mxu1 }
 0x1ad   :  { %v606_v18 = vmax.f32 %v506_v16, 0.0  ;;  %v634_v23 = vpack.c.bf16 %v608_v59, %v607_v19  ;;  %v527_v27 = vadd.f32 %v1084_v17, %v1391_v43 }
 0x1ae   :  { %v518_v20 = vpop.f32.mrf.mxu1 }
 0x1af   :  { %v633_v21 = vpack.c.bf16 %v606_v18, %v605_v4  ;;  %v519_v25 = vadd.f32 %v1391_v43, %v518_v20  ;;  %v611_v33 = vmax.f32 %v527_v27, 0.0 }
 0x1b0   :  { %v1085_v24 = vpop.f32.mrf.mxu1 }
 0x1b1   :  { %v530_v26 = vadd.f32 %v1085_v24, %v1391_v43  ;;  %1114 = vmatprep.mubr.msk.bf16.mxu0 %vm668_vm2, %v633_v21  ;;  %v609_v30 = vmax.f32 %v519_v25, 0.0 }
 0x1b2   :  { %v521_v28 = vpop.f32.mrf.mxu1  ;;  %1115 = vmatmul.mubr.msk.bf16.gmra.mxu0 %vm668_vm2, %v634_v23 }
 0x1b3   :  { %v522_v29 = vadd.f32 %v1391_v43, %v521_v28  ;;  %v612_v13 = vmax.f32 %v530_v26, 0.0 }
 0x1b4   :  { %v1088_v22 = vpop.f32.mrf.mxu1 }
 0x1b5   :  { %v610_v32 = vmax.f32 %v522_v29, 0.0  ;;  %v636_v36 = vpack.c.bf16 %v612_v13, %v611_v33  ;;  %v543_v39 = vadd.f32 %v1088_v22, %v1391_v43  ;;  %v1444_v29 = vld [vmem:[%s1612_s6] ss:$0 sm:$0xff] }
 0x1b6   :  { %v534_v34 = vpop.f32.mrf.mxu1 }
 0x1b7   :  { %v635_v35 = vpack.c.bf16 %v610_v32, %v609_v30  ;;  %v535_v38 = vadd.f32 %v1391_v43, %v534_v34  ;;  %v615_v46 = vmax.f32 %v543_v39, 0.0 }
 0x1b8   :  { %v1089_v37 = vpop.f32.mrf.mxu1 }
 0x1b9   :  { %v546_v31 = vadd.f32 %v1089_v37, %v1391_v43  ;;  %1118 = vmatprep.mubr.msk.bf16.mxu0 %vm668_vm2, %v635_v35  ;;  %v613_v45 = vmax.f32 %v535_v38, 0.0 }
 0x1ba   :  { %v537_v40 = vpop.f32.mrf.mxu1  ;;  %1119 = vmatmul.mubr.msk.bf16.gmra.mxu0 %vm668_vm2, %v636_v36 }
 0x1bb   :  { %v538_v41 = vadd.f32 %v1391_v43, %v537_v40  ;;  %v616_v42 = vmax.f32 %v546_v31, 0.0 }
 0x1bc   :  { %v1092_v44 = vpop.f32.mrf.mxu1 }
 0x1bd   :  { %v614_v57 = vmax.f32 %v538_v41, 0.0  ;;  %v638_v49 = vpack.c.bf16 %v616_v42, %v615_v46  ;;  %v559_v53 = vadd.f32 %v1092_v44, %v1391_v43 }
 0x1be   :  { %v550_v47 = vpop.f32.mrf.mxu1 }
 0x1bf   :  { %v637_v48 = vpack.c.bf16 %v614_v57, %v613_v45  ;;  %v551_v51 = vadd.f32 %v1391_v43, %v550_v47  ;;  %v619_v62 = vmax.f32 %v559_v53, 0.0 }
 0x1c0   :  { %v1093_v50 = vpop.f32.mrf.mxu1 }
 0x1c1   :  { %v562_v52 = vadd.f32 %v1093_v50, %v1391_v43  ;;  %1122 = vmatprep.mubr.msk.bf16.mxu0 %vm668_vm2, %v637_v48  ;;  %v617_v60 = vmax.f32 %v551_v51, 0.0 }
 0x1c2   :  { %v553_v54 = vpop.f32.mrf.mxu1  ;;  %1123 = vmatmul.mubr.msk.bf16.gmra.mxu0 %vm668_vm2, %v638_v49 }
 0x1c3   :  { %v554_v55 = vadd.f32 %v1391_v43, %v553_v54  ;;  %v620_v56 = vmax.f32 %v562_v52, 0.0 }
 0x1c4   :  { %v1096_v58 = vpop.f32.mrf.mxu1 }
 0x1c5   :  { %v618_v61 = vmax.f32 %v554_v55, 0.0  ;;  %v640_v1 = vpack.c.bf16 %v620_v56, %v619_v62  ;;  %v575_v6 = vadd.f32 %v1096_v58, %v1391_v43 }
 0x1c6   :  { %v566_v63 = vpop.f32.mrf.mxu1 }
 0x1c7   :  { %v639_v0 = vpack.c.bf16 %v618_v61, %v617_v60  ;;  %v567_v3 = vadd.f32 %v1391_v43, %v566_v63  ;;  %v623_v14 = vmax.f32 %v575_v6, 0.0 }
 0x1c8   :  { %v1097_v2 = vpop.f32.mrf.mxu1 }
 0x1c9   :  { %v578_v5 = vadd.f32 %v1097_v2, %v1391_v43  ;;  %1126 = vmatprep.mubr.msk.bf16.mxu0 %vm668_vm2, %v639_v0  ;;  %v621_v11 = vmax.f32 %v567_v3, 0.0 }
 0x1ca   :  { %v569_v7 = vpop.f32.mrf.mxu1  ;;  %1127 = vmatmul.mubr.msk.bf16.gmra.mxu0 %vm668_vm2, %v640_v1 }
 0x1cb   :  { %v570_v8 = vadd.f32 %v1391_v43, %v569_v7  ;;  %v624_v9 = vmax.f32 %v578_v5, 0.0 }
 0x1cc   :  { %v1100_v10 = vpop.f32.mrf.mxu1 }
 0x1cd   :  { %v622_v12 = vmax.f32 %v570_v8, 0.0  ;;  %v642_v59 = vpack.c.bf16 %v624_v9, %v623_v14  ;;  %v591_v19 = vadd.f32 %v1100_v10, %v1391_v43 }
 0x1ce   :  { %v582_v15 = vpop.f32.mrf.mxu1 }
 0x1cf   :  { %v641_v16 = vpack.c.bf16 %v622_v12, %v621_v11  ;;  %v583_v4 = vadd.f32 %v1391_v43, %v582_v15  ;;  %v627_v26 = vmax.f32 %v591_v19, 0.0 }
 0x1d0   :  { %v1101_v17 = vpop.f32.mrf.mxu1 }
 0x1d1   :  { %v594_v18 = vadd.f32 %v1101_v17, %v1391_v43  ;;  %1130 = vmatprep.mubr.msk.bf16.mxu0 %vm668_vm2, %v641_v16  ;;  %v625_v24 = vmax.f32 %v583_v4, 0.0 }
 0x1d2   :  { %v585_v20 = vpop.f32.mrf.mxu1  ;;  %1131 = vmatmul.mubr.msk.bf16.gmra.mxu0 %vm668_vm2, %v642_v59 }
 0x1d3   :  { %v586_v21 = vadd.f32 %v1391_v43, %v585_v20  ;;  %v628_v23 = vmax.f32 %v594_v18, 0.0 }
 0x1d5   :  { %v626_v25 = vmax.f32 %v586_v21, 0.0  ;;  %v644_v28 = vpack.c.bf16 %v628_v23, %v627_v26 }
 0x1d7   :  { %v643_v27 = vpack.c.bf16 %v626_v25, %v625_v24 }
 0x1d9   :  { %1134 = vmatprep.mubr.msk.bf16.mxu0 %vm668_vm2, %v643_v27 }
 0x1da   :  { %1135 = vmatmul.mubr.msk.bf16.gmra.mxu0 %vm668_vm2, %v644_v28 }
 0x262   :  { %v1108_v13 = vpop.f32.mrf.mxu0 }
 0x263   :  { %v760_v22 = vadd.f32 %v1108_v13, %v1444_v29 }
 0x264   :  { %v751_v43 = vpop.f32.mrf.mxu0 }
 0x265   :  { %881 = vst.msk [vmem:[%s1613_s7 + $0x10] sm:$0xff] %vm878_vm3, %v760_v22  ;;  %v752_v30 = vadd.f32 %v1444_v29, %v751_v43 }
 0x266   :  { %v1109_v32 = vpop.f32.mrf.mxu0 }
 0x267   :  { %879 = vst.msk [vmem:[%s1613_s7] sm:$0xff] %vm878_vm3, %v752_v30  ;;  %v763_v33 = vadd.f32 %v1109_v32, %v1444_v29 }
 0x268   :  { %v754_v34 = vpop.f32.mrf.mxu0 }
 0x269   :  { %882 = vst.msk [vmem:[%s1613_s7 + $0x18] sm:$0xff] %vm878_vm3, %v763_v33  ;;  %v755_v35 = vadd.f32 %v1444_v29, %v754_v34 }
 0x26a   :  { %v1112_v36 = vpop.f32.mrf.mxu0 }
 0x26b   :  { %880 = vst.msk [vmem:[%s1613_s7 + $0x8] sm:$0xff] %vm878_vm3, %v755_v35  ;;  %v776_v37 = vadd.f32 %v1112_v36, %v1444_v29 }
 0x26c   :  { %v767_v38 = vpop.f32.mrf.mxu0 }
 0x26d   :  { %885 = vst.msk [vmem:[%s1613_s7 + $0x30] sm:$0xff] %vm878_vm3, %v776_v37  ;;  %v768_v31 = vadd.f32 %v1444_v29, %v767_v38 }
 0x26e   :  { %v1113_v39 = vpop.f32.mrf.mxu0 }
 0x26f   :  { %883 = vst.msk [vmem:[%s1613_s7 + $0x20] sm:$0xff] %vm878_vm3, %v768_v31  ;;  %v779_v40 = vadd.f32 %v1113_v39, %v1444_v29 }
 0x270   :  { %v770_v41 = vpop.f32.mrf.mxu0 }
 0x271   :  { %886 = vst.msk [vmem:[%s1613_s7 + $0x38] sm:$0xff] %vm878_vm3, %v779_v40  ;;  %v771_v42 = vadd.f32 %v1444_v29, %v770_v41 }
 0x272   :  { %v1116_v44 = vpop.f32.mrf.mxu0 }
 0x273   :  { %884 = vst.msk [vmem:[%s1613_s7 + $0x28] sm:$0xff] %vm878_vm3, %v771_v42  ;;  %v792_v45 = vadd.f32 %v1116_v44, %v1444_v29 }
 0x274   :  { %v783_v57 = vpop.f32.mrf.mxu0 }
 0x275   :  { %889 = vst.msk [vmem:[%s1613_s7 + $0x50] sm:$0xff] %vm878_vm3, %v792_v45  ;;  %v784_v46 = vadd.f32 %v1444_v29, %v783_v57 }
 0x276   :  { %v1117_v47 = vpop.f32.mrf.mxu0 }
 0x277   :  { %887 = vst.msk [vmem:[%s1613_s7 + $0x40] sm:$0xff] %vm878_vm3, %v784_v46  ;;  %v795_v48 = vadd.f32 %v1117_v47, %v1444_v29 }
 0x278   :  { %v786_v49 = vpop.f32.mrf.mxu0 }
 0x279   :  { %890 = vst.msk [vmem:[%s1613_s7 + $0x58] sm:$0xff] %vm878_vm3, %v795_v48  ;;  %v787_v50 = vadd.f32 %v1444_v29, %v786_v49 }
 0x27a   :  { %v1120_v51 = vpop.f32.mrf.mxu0 }
 0x27b   :  { %888 = vst.msk [vmem:[%s1613_s7 + $0x48] sm:$0xff] %vm878_vm3, %v787_v50  ;;  %v808_v52 = vadd.f32 %v1120_v51, %v1444_v29 }
 0x27c   :  { %v799_v53 = vpop.f32.mrf.mxu0 }
 0x27d   :  { %893 = vst.msk [vmem:[%s1613_s7 + $0x70] sm:$0xff] %vm878_vm3, %v808_v52  ;;  %v800_v54 = vadd.f32 %v1444_v29, %v799_v53 }
 0x27e   :  { %v1121_v55 = vpop.f32.mrf.mxu0 }
 0x27f   :  { %891 = vst.msk [vmem:[%s1613_s7 + $0x60] sm:$0xff] %vm878_vm3, %v800_v54  ;;  %v811_v56 = vadd.f32 %v1121_v55, %v1444_v29 }
 0x280   :  { %v802_v58 = vpop.f32.mrf.mxu0 }
 0x281   :  { %894 = vst.msk [vmem:[%s1613_s7 + $0x78] sm:$0xff] %vm878_vm3, %v811_v56  ;;  %v803_v60 = vadd.f32 %v1444_v29, %v802_v58 }
 0x282   :  { %v1124_v61 = vpop.f32.mrf.mxu0 }
 0x283   :  { %892 = vst.msk [vmem:[%s1613_s7 + $0x68] sm:$0xff] %vm878_vm3, %v803_v60  ;;  %v824_v62 = vadd.f32 %v1124_v61, %v1444_v29 }
 0x284   :  { %v815_v63 = vpop.f32.mrf.mxu0 }
 0x285   :  { %897 = vst.msk [vmem:[%s1613_s7 + $0x90] sm:$0xff] %vm878_vm3, %v824_v62  ;;  %v816_v0 = vadd.f32 %v1444_v29, %v815_v63 }
 0x286   :  { %v1125_v1 = vpop.f32.mrf.mxu0 }
 0x287   :  { %895 = vst.msk [vmem:[%s1613_s7 + $0x80] sm:$0xff] %vm878_vm3, %v816_v0  ;;  %v827_v2 = vadd.f32 %v1125_v1, %v1444_v29 }
 0x288   :  { %v818_v3 = vpop.f32.mrf.mxu0 }
 0x289   :  { %898 = vst.msk [vmem:[%s1613_s7 + $0x98] sm:$0xff] %vm878_vm3, %v827_v2  ;;  %v819_v5 = vadd.f32 %v1444_v29, %v818_v3 }
 0x28a   :  { %v1128_v6 = vpop.f32.mrf.mxu0 }
 0x28b   :  { %896 = vst.msk [vmem:[%s1613_s7 + $0x88] sm:$0xff] %vm878_vm3, %v819_v5  ;;  %v840_v7 = vadd.f32 %v1128_v6, %v1444_v29 }
 0x28c   :  { %v831_v8 = vpop.f32.mrf.mxu0 }
 0x28d   :  { %901 = vst.msk [vmem:[%s1613_s7 + $0xb0] sm:$0xff] %vm878_vm3, %v840_v7  ;;  %v832_v9 = vadd.f32 %v1444_v29, %v831_v8 }
 0x28e   :  { %v1129_v10 = vpop.f32.mrf.mxu0 }
 0x28f   :  { %899 = vst.msk [vmem:[%s1613_s7 + $0xa0] sm:$0xff] %vm878_vm3, %v832_v9  ;;  %v843_v11 = vadd.f32 %v1129_v10, %v1444_v29 }
 0x290   :  { %v834_v12 = vpop.f32.mrf.mxu0 }
 0x291   :  { %902 = vst.msk [vmem:[%s1613_s7 + $0xb8] sm:$0xff] %vm878_vm3, %v843_v11  ;;  %v835_v14 = vadd.f32 %v1444_v29, %v834_v12 }
 0x292   :  { %v1132_v15 = vpop.f32.mrf.mxu0 }
 0x293   :  { %900 = vst.msk [vmem:[%s1613_s7 + $0xa8] sm:$0xff] %vm878_vm3, %v835_v14  ;;  %v856_v16 = vadd.f32 %v1132_v15, %v1444_v29 }
 0x294   :  { %v847_v59 = vpop.f32.mrf.mxu0 }
 0x295   :  { %905 = vst.msk [vmem:[%s1613_s7 + $0xd0] sm:$0xff] %vm878_vm3, %v856_v16  ;;  %v848_v17 = vadd.f32 %v1444_v29, %v847_v59 }
 0x296   :  { %v1133_v4 = vpop.f32.mrf.mxu0 }
 0x297   :  { %903 = vst.msk [vmem:[%s1613_s7 + $0xc0] sm:$0xff] %vm878_vm3, %v848_v17  ;;  %v859_v18 = vadd.f32 %v1133_v4, %v1444_v29 }
 0x298   :  { %v850_v19 = vpop.f32.mrf.mxu0 }
 0x299   :  { %906 = vst.msk [vmem:[%s1613_s7 + $0xd8] sm:$0xff] %vm878_vm3, %v859_v18  ;;  %v851_v20 = vadd.f32 %v1444_v29, %v850_v19 }
 0x29a   :  { %v1136_v21 = vpop.f32.mrf.mxu0 }
 0x29b   :  { %904 = vst.msk [vmem:[%s1613_s7 + $0xc8] sm:$0xff] %vm878_vm3, %v851_v20  ;;  %v872_v23 = vadd.f32 %v1136_v21, %v1444_v29 }
 0x29c   :  { %v863_v24 = vpop.f32.mrf.mxu0 }
 0x29d   :  { %909 = vst.msk [vmem:[%s1613_s7 + $0xf0] sm:$0xff] %vm878_vm3, %v872_v23  ;;  %v864_v25 = vadd.f32 %v1444_v29, %v863_v24 }
 0x29e   :  { %v1137_v26 = vpop.f32.mrf.mxu0 }
 0x29f   :  { %907 = vst.msk [vmem:[%s1613_s7 + $0xe0] sm:$0xff] %vm878_vm3, %v864_v25  ;;  %v875_v27 = vadd.f32 %v1137_v26, %v1444_v29 }
 0x2a0   :  { %v866_v28 = vpop.f32.mrf.mxu0 }
 0x2a1   :  { %910 = vst.msk [vmem:[%s1613_s7 + $0xf8] sm:$0xff] %vm878_vm3, %v875_v27  ;;  %v867_v13 = vadd.f32 %v1444_v29, %v866_v28 }
 0x2a3   :  { %908 = vst.msk [vmem:[%s1613_s7 + $0xe8] sm:$0xff] %vm878_vm3, %v867_v13 }

</bundles_post_ra>
